<compile_context>
chip_gen: v7x
topology: tpu7x:2x2x1
jax: 0.10.0
libtpu: 0.0.40
codegen_flags: <defaults>
</compile_context>

<pallas_src>
import functools

import jax
import jax.numpy as jnp
from jax.experimental import pallas as pl
from jax.experimental.pallas import tpu as pltpu


def _weighted_loss_kernel(u_ref, v_ref, o_ref, *, a, b):
    # Upcast per-vreg (free VPU work hidden under DMA on this mem-bound op),
    # single a*u + b*v with pre-folded weights, downcast on store.
    u = u_ref[...].astype(jnp.float32)
    v = v_ref[...].astype(jnp.float32)
    o_ref[...] = (a * u + b * v).astype(o_ref.dtype)


def _sublane_multiple(dtype):
    # Layout tile is (8,128) for 32-bit, (16,128) for 16-bit, (32,128) for 8-bit.
    return max(8, 32 // jnp.dtype(dtype).itemsize)


def _plan_slab(n, sub):
    """Pick a lane-dense (W, rows) layout; prefer a zero-padding layout."""
    for w in (4096, 2048, 1024, 512, 256, 128):
        if n % w == 0:
            return w, n // w            # fast path: no padding needed
    # Fallback: pad only the flat tail up to an aligned slab.
    w = 1024 if n >= 1024 else 128
    rows = -(-n // w)                   # ceil div
    rows = -(-rows // sub) * sub        # round rows up to sublane multiple
    return w, rows


def weighted_loss(u_loss, v_loss, loss_weight=(0.77, 0.54)):
    """JAX/Pallas equivalent of Weighted_loss.forward (elementwise)."""
    # TODO(synk): the PyTorch module would also broadcast mismatched shapes;
    # only identical shapes are supported here.
    assert u_loss.shape == v_loss.shape, "u_loss and v_loss must match in shape"

    orig_shape = u_loss.shape
    n = int(u_loss.size)

    # PyTorch-style promotion: python-float weights keep float dtypes as-is,
    # integer inputs promote to float32.
    out_dtype = jnp.result_type(u_loss.dtype, v_loss.dtype)
    if not jnp.issubdtype(out_dtype, jnp.floating):
        out_dtype = jnp.float32

    w0 = float(loss_weight[0])
    w1 = float(loss_weight[1])
    s = w0 + w1
    a, b = w0 / s, w1 / s               # pre-folded weights

    sub = max(_sublane_multiple(u_loss.dtype),
              _sublane_multiple(v_loss.dtype),
              _sublane_multiple(out_dtype))

    w, rows = _plan_slab(n, sub)
    padded = rows * w

    u_flat = u_loss.reshape(-1)
    v_flat = v_loss.reshape(-1)
    if padded != n:                     # slow path: pad only the tail
        u_flat = jnp.pad(u_flat, (0, padded - n))
        v_flat = jnp.pad(v_flat, (0, padded - n))
    u2 = u_flat.reshape(rows, w)
    v2 = v_flat.reshape(rows, w)

    # Row tiling: ~512K elements per block (~2 MiB f32 per buffer), so
    # 3 arrays x 2 buffers stays far below the scoped VMEM default on all
    # generations (incl. v7x's 64 MiB physical), while the grid has many
    # "parallel" steps for pipelining / megacore.
    target_elems = 512 * 1024
    tile_rows = max(sub, (target_elems // w) // sub * sub)
    if tile_rows >= rows:
        tile_rows = rows                # whole-slab single tile (small inputs)
    num_tiles = pl.cdiv(rows, tile_rows)

    cost = pl.CostEstimate(
        flops=3 * n,
        transcendentals=0,
        bytes_accessed=n * (jnp.dtype(u_loss.dtype).itemsize
                            + jnp.dtype(v_loss.dtype).itemsize
                            + jnp.dtype(out_dtype).itemsize),
    )

    kernel = functools.partial(_weighted_loss_kernel, a=a, b=b)

    out2 = pl.pallas_call(
        kernel,
        out_shape=jax.ShapeDtypeStruct((rows, w), out_dtype),
        grid_spec=pltpu.PrefetchScalarGridSpec(
            num_scalar_prefetch=0,
            grid=(num_tiles,),
            in_specs=[
                pl.BlockSpec((tile_rows, w), lambda i: (i, 0)),
                pl.BlockSpec((tile_rows, w), lambda i: (i, 0)),
            ],
            out_specs=pl.BlockSpec((tile_rows, w), lambda i: (i, 0)),
        ),
        compiler_params=pltpu.CompilerParams(
            dimension_semantics=("parallel",)),
        cost_estimate=cost,
    )(u2, v2)

    if padded != n:
        return out2.reshape(-1)[:n].reshape(orig_shape)
    return out2.reshape(orig_shape)


if __name__ == "__main__":
    key = jax.random.PRNGKey(0)
    k1, k2 = jax.random.split(key)

    # Small per-pixel loss maps, e.g. batch=2, channels=4, spatial=16x16
    shape = (2, 4, 16, 16)
    u_loss = jax.random.uniform(k1, shape, dtype=jnp.float32)
    v_loss = jax.random.uniform(k2, shape, dtype=jnp.float32)

    out = weighted_loss(u_loss, v_loss, loss_weight=(0.77, 0.54))
    out = jax.block_until_ready(out)

    # Reference check against plain JAX
    w0, w1 = 0.77, 0.54
    ref = (w0 * u_loss + w1 * v_loss) / (w0 + w1)
    assert out.shape == u_loss.shape
    assert out.dtype == u_loss.dtype
    assert jnp.allclose(out, ref, atol=1e-6, rtol=1e-6), "mismatch vs reference"

    print("KERNEL_OK")
</pallas_src>

<mosaic_0001>
module attributes {stable_mosaic.version = 11 : i64} {
  func.func @_weighted_loss_kernel(%arg0: i32, %arg1: memref<1x2048xf32, #tpu.memory_space<vmem>>, %arg2: memref<1x2048xf32, #tpu.memory_space<vmem>>, %arg3: memref<1x2048xf32, #tpu.memory_space<vmem>>) attributes {dimension_semantics = [#tpu.dimension_semantics<parallel>], iteration_bounds = array<i64: 1>, scalar_prefetch = 0 : i64, scratch_operands = 0 : i64, tpu.core_type = #tpu.core_type<tc>, window_params = [{transform_indices = @transform_0, window_bounds = array<i64: 1, 2048>}, {transform_indices = @transform_1, window_bounds = array<i64: 1, 2048>}, {transform_indices = @transform_2, window_bounds = array<i64: 1, 2048>}]} {
    %c0 = arith.constant 0 : index
    %c0_0 = arith.constant 0 : index
    %0 = vector.load %arg1[%c0, %c0_0] : memref<1x2048xf32, #tpu.memory_space<vmem>>, vector<1x2048xf32>
    %c0_1 = arith.constant 0 : index
    %c0_2 = arith.constant 0 : index
    %1 = vector.load %arg2[%c0_1, %c0_2] : memref<1x2048xf32, #tpu.memory_space<vmem>>, vector<1x2048xf32>
    %cst = arith.constant 0.587786257 : f32
    %2 = vector.broadcast %cst : f32 to vector<1x2048xf32>
    %3 = arith.mulf %2, %0 : vector<1x2048xf32>
    %cst_3 = arith.constant 0.412213743 : f32
    %4 = vector.broadcast %cst_3 : f32 to vector<1x2048xf32>
    %5 = arith.mulf %4, %1 : vector<1x2048xf32>
    %6 = arith.addf %3, %5 : vector<1x2048xf32>
    %c0_4 = arith.constant 0 : index
    %c0_5 = arith.constant 0 : index
    %7 = vector.load %arg3[%c0_4, %c0_5] : memref<1x2048xf32, #tpu.memory_space<vmem>>, vector<1x2048xf32>
    tpu.vector_store %arg3[%c0_4, %c0_5], %6 {strides = array<i32>} : memref<1x2048xf32, #tpu.memory_space<vmem>>, vector<1x2048xf32>,
    return
  }
  func.func @transform_0(%arg0: i32) -> (i32, i32) {
    %c0_i32 = arith.constant 0 : i32
    %c0_i32_0 = arith.constant 0 : i32
    return %arg0, %c0_i32 : i32, i32
  }
  func.func @transform_1(%arg0: i32) -> (i32, i32) {
    %c0_i32 = arith.constant 0 : i32
    %c0_i32_0 = arith.constant 0 : i32
    return %arg0, %c0_i32 : i32, i32
  }
  func.func @transform_2(%arg0: i32) -> (i32, i32) {
    %c0_i32 = arith.constant 0 : i32
    %c0_i32_0 = arith.constant 0 : i32
    return %arg0, %c0_i32 : i32, i32
  }
}

</mosaic_0001>

<bundles_post_ra>
// kernel: tpu_custom_call.1
= control target key start
LH: loop header
LB: loop body
LE: loop exit
PB: predicated region body
PF: predicated region fallthrough
CT: control target
= control target key end

     0   :  { %7 = vsyncpa [#allocation3], 0  ;;  %s193_s0 = inlined_call_operand.hbm [shape: f32[1,2048], index: 0, kind: input, shape index: {}]   ;;  %s194_s1 = inlined_call_operand.hbm [shape: f32[1,2048], index: 1, kind: input, shape index: {}]   ;;  %s195_s2 = inlined_call_operand.hbm [shape: f32[1,2048], index: 2, kind: output, shape index: {}]  }
   0x1   :  { %8 = vsyncpa [#allocation6], 0 }
   0x2   :  { %9 = vsyncpa [#allocation4], 0  ;;  %s139_s9 = smov [#allocation2]   ;;  %s140_s11 = smov [#allocation5]  }
   0x3   :  { %s16_s10 = sshll.u32 %s139_s9, 4  ;;  %s26_s12 = sshll.u32 %s140_s11, 4  ;;  %s17_s10 = int_to_ptr.vmem [resolvable:$true] %s16_s10  ;;  %s27_s12 = int_to_ptr.vmem [resolvable:$true] %s26_s12 }
   0x4   :  { %s67_s15 = scalar_lea.hbm %s193_s0, 256 }
   0x5   :  { %p68_p0 = scmp.ne.s32.totalorder %s193_s0, %s67_s15  ;;  %p71_p1 = scmp.lt.u32.totalorder %s67_s15, %s193_s0 }
   0x7   :  { %p73_p2 = pnand %p71_p1, %p68_p0 }
   0x9   :  { %76 = shalt.err (!%p73_p2)
}
   0xa   :  { %s77_s20 = scalar_lea.vmem %s17_s10, 256  ;;  %p82_p4 = scmp.lt.s32.totalorder %s17_s10, %s17_s10 }
   0xb   :  { %p78_p3 = scmp.ne.s32.totalorder %s17_s10, %s77_s20  ;;  %p83_p5 = scmp.lt.s32.totalorder %s77_s20, %s77_s20 }
   0xd   :  { %p84_p6 = por %p83_p5, %p82_p4 }
   0xf   :  { %p85_p7 = pnand %p84_p6, %p78_p3 }
  0x11   :  { %88 = shalt.err (!%p85_p7)
}
  0x12   :  { %19 = dma.hbm_to_vmem [thread:$0]  %s193_s0, 256, %s17_s10, [#allocation3]  }
  0x13   :  { %s89_s25 = scalar_lea.hbm %s194_s1, 256 }
  0x14   :  { %p90_p8 = scmp.ne.s32.totalorder %s194_s1, %s89_s25  ;;  %p93_p9 = scmp.lt.u32.totalorder %s89_s25, %s194_s1 }
  0x16   :  { %p95_p10 = pnand %p93_p9, %p90_p8 }
  0x18   :  { %98 = shalt.err (!%p95_p10)
}
  0x19   :  { %s99_s30 = scalar_lea.vmem %s27_s12, 256  ;;  %p104_p12 = scmp.lt.s32.totalorder %s27_s12, %s27_s12 }
  0x1a   :  { %p100_p11 = scmp.ne.s32.totalorder %s27_s12, %s99_s30  ;;  %p105_p13 = scmp.lt.s32.totalorder %s99_s30, %s99_s30 }
  0x1c   :  { %p106_p0 = por %p105_p13, %p104_p12 }
  0x1e   :  { %p107_p1 = pnand %p106_p0, %p100_p11 }
  0x20   :  { %110 = shalt.err (!%p107_p1)
}
  0x21   :  { %29 = dma.hbm_to_vmem [thread:$0]  %s194_s1, 256, %s27_s12, [#allocation6]  }
  0x22   :  { %133 = dma.done.wait [#allocation3], 256  }
  0x23   :  { %134 = vsyncadd [#allocation3], 4294967040 }
  0x24   :  { %135 = dma.done.wait [#allocation6], 256  }
  0x25   :  { %136 = vsyncadd [#allocation6], 4294967040  ;;  %v36_v0 = vld [vmem:[#allocation2] sm:$0xff]  ;;  %v38_v1 = vld [vmem:[#allocation5] sm:$0xff]  ;;  %s141_s4 = smov [#allocation7]  }
  0x26   :  { %v37_v2 = vld [vmem:[#allocation2 + $0x8] sm:$0xff]  ;;  %v40_v3 = vmul.f32 0.58778626, %v36_v0  ;;  %v42_v4 = vmul.f32 0.41221374, %v38_v1  ;;  %v39_v5 = vld [vmem:[#allocation5 + $0x8] sm:$0xff] }
  0x27   :  { %s54_s5 = sshll.u32 %s141_s4, 4  ;;  %v41_v6 = vmul.f32 0.58778626, %v37_v2  ;;  %v43_v7 = vmul.f32 0.41221374, %v39_v5  ;;  %s55_s5 = int_to_ptr.vmem [resolvable:$true] %s54_s5 }
  0x28   :  { %v44_v8 = vadd.f32 %v42_v4, %v40_v3  ;;  %s111_s1 = scalar_lea.vmem %s55_s5, 256  ;;  %p116_p3 = scmp.lt.s32.totalorder %s55_s5, %s55_s5 }
  0x29   :  { %v45_v9 = vadd.f32 %v43_v7, %v41_v6  ;;  %p112_p2 = scmp.ne.s32.totalorder %s55_s5, %s111_s1  ;;  %p117_p4 = scmp.lt.s32.totalorder %s111_s1, %s111_s1 }
  0x2a   :  { %46 = vst [vmem:[#allocation7] sm:$0xff] %v44_v8 }
  0x2b   :  { %47 = vst [vmem:[#allocation7 + $0x8] sm:$0xff] %v45_v9  ;;  %p118_p5 = por %p117_p4, %p116_p3 }
  0x2d   :  { %p119_p6 = pnand %p118_p5, %p112_p2 }
  0x2f   :  { %122 = shalt.err (!%p119_p6)
}
  0x30   :  { %s123_s8 = scalar_lea.hbm %s195_s2, 256 }
  0x31   :  { %p124_p7 = scmp.ne.s32.totalorder %s195_s2, %s123_s8  ;;  %p127_p8 = scmp.lt.u32.totalorder %s123_s8, %s195_s2 }
  0x33   :  { %p129_p9 = pnand %p127_p8, %p124_p7 }
  0x35   :  { %132 = shalt.err (!%p129_p9)
}
  0x36   :  { %57 = dma.vmem_to_hbm [thread:$0]  %s55_s5, 256, %s195_s2, [#allocation4]  }
  0x37   :  { %137 = dma.done.wait [#allocation4], 256  }
  0x38   :  { %138 = vsyncadd [#allocation4], 4294967040 }
  0x39   :  { %61 = vsyncpa [#allocation3], 1 }
  0x3a   :  { %62 = vsyncpa [#allocation6], 1 }
  0x3b   :  { %63 = vsyncpa [#allocation4], 1 }

</bundles_post_ra>
